<compile_context>
chip_gen: v6e
topology: v6e:2x2x1
jax: 0.10.0
libtpu: 0.0.40
codegen_flags: <defaults>
</compile_context>

<pallas_src>
import functools

import jax
import jax.numpy as jnp
from jax.experimental import pallas as pl
from jax.experimental.pallas import tpu as pltpu


def _round_up(x, m):
    return ((x + m - 1) // m) * m


def _num_tensorcores():
    """Best-effort TensorCore count per JAX device (2 on v7x / megacore chips)."""
    try:
        d = jax.devices()[0]
        nc = getattr(d, "num_cores", None)
        if nc:
            return int(nc)
        kind = str(getattr(d, "device_kind", "")).lower()
        if "v7" in kind or "v4" in kind or "v5p" in kind:
            return 2
    except Exception:
        pass
    return 1


def _vmem_capacity_bytes():
    try:
        return int(pltpu.get_tpu_info().vmem_capacity_bytes)
    except Exception:
        return 64 << 20  # conservative default: v7x per-TC VMEM


def _choose_row_tile(M, num_cores):
    """Row tile (lane-axis width) for the transposed activations."""
    if num_cores >= 2 and M >= 1024:
        # Split across TensorCores only when each core gets a substantial tile.
        return min(2048, _round_up(pl.cdiv(M, num_cores), 128))
    if M > 1024:
        return 1024
    # Single full-extent block: exempt from the 128-divisibility rule, no
    # padding, no pointless grid split on single-TC chips.
    return M


def _fused_mlp_kernel(x_ref, *refs, num_layers):
    """Transposed fused MLP on one row tile.

    x_ref : (in_dim, tm)  -- rows of the original x sit on the 128-lane axis
    refs  : (w0, b0, w1, b1, ..., o_ref); w_l (out_l, in_l), b_l (out_l, 1)
    o_ref : (out_dim, tm)
    """
    o_ref = refs[2 * num_layers]
    h = x_ref[...].astype(jnp.float32)
    for i in range(num_layers):
        w_ref = refs[2 * i]
        b_ref = refs[2 * i + 1]
        # MXU matmul in the weights' dtype (f32 or bf16), f32 accumulation.
        acc = jnp.dot(w_ref[...], h.astype(w_ref.dtype),
                      preferred_element_type=jnp.float32)
        acc = acc + b_ref[...].astype(jnp.float32)   # (out, 1) broadcasts on lanes
        h = jnp.maximum(acc, 0.0) if i < num_layers - 1 else acc
    o_ref[...] = h.astype(o_ref.dtype)


def fused_mlp_t(xT, prepared):
    """y.T = MLP(x).T ; xT: (in_dim, M) -> returns (out_dim, M)."""
    in_dim, M = xT.shape
    out_dim = prepared[-1][0].shape[0]
    num_layers = len(prepared)
    dtype = xT.dtype

    num_cores = _num_tensorcores()
    tm = _choose_row_tile(M, num_cores)
    nm = pl.cdiv(M, tm)  # ragged last block: OOB output writes are dropped

    # x / out tiled over rows (lane axis); weights & biases fully VMEM-resident.
    in_specs = [pl.BlockSpec((in_dim, tm), lambda i: (0, i))]
    flat_params = []
    for w, b in prepared:
        n_out, n_in = w.shape
        in_specs.append(pl.BlockSpec((n_out, n_in), lambda i: (0, 0)))
        in_specs.append(pl.BlockSpec((n_out, 1), lambda i: (0, 0)))
        flat_params += [w, b]
    out_specs = pl.BlockSpec((out_dim, tm), lambda i: (0, i))
    # TODO(synk): for hidden widths whose weights no longer fit VMEM, fall back
    # to a K/N-tiled per-layer matmul instead of the weight-resident fused path.

    param_bytes = sum(int(a.size) * a.dtype.itemsize for a in flat_params)
    flops = 2 * M * sum(int(w.shape[0]) * int(w.shape[1]) for w, _ in prepared)
    io_bytes = (M * in_dim + M * out_dim) * dtype.itemsize + param_bytes
    max_width = max([in_dim] + [int(w.shape[0]) for w, _ in prepared])
    est_vmem = (param_bytes
                + 2 * in_dim * tm * dtype.itemsize      # x tile (double-buffered)
                + 2 * out_dim * tm * dtype.itemsize     # out tile (double-buffered)
                + 2 * max_width * tm * 4)               # f32 intermediates headroom
    vmem_limit = int(min(0.75 * _vmem_capacity_bytes(),
                         max(8 << 20, 2 * est_vmem)))

    return pl.pallas_call(
        functools.partial(_fused_mlp_kernel, num_layers=num_layers),
        out_shape=jax.ShapeDtypeStruct((out_dim, M), dtype),
        grid_spec=pltpu.PrefetchScalarGridSpec(
            num_scalar_prefetch=0,
            grid=(nm,),
            in_specs=in_specs,
            out_specs=out_specs,
        ),
        compiler_params=pltpu.CompilerParams(
            dimension_semantics=("parallel",),
            vmem_limit_bytes=vmem_limit,
        ),
        cost_estimate=pl.CostEstimate(
            flops=flops, transcendentals=0, bytes_accessed=io_bytes),
    )(xT, *flat_params)


def init_mlp_params(key, input_dim, hidden_dim, output_dim, num_layers,
                    dtype=jnp.float32):
    """nn.Linear-shaped params: w (out, in), b (out,), uniform(+-1/sqrt(in))."""
    h = [hidden_dim] * (num_layers - 1)
    params = []
    for n, k in zip([input_dim] + h, h + [output_dim]):
        key, kw, kb = jax.random.split(key, 3)
        bound = 1.0 / (n ** 0.5)
        w = jax.random.uniform(kw, (k, n), dtype, -bound, bound)
        b = jax.random.uniform(kb, (k,), dtype, -bound, bound)
        params.append((w, b))
    return params


def prepare_mlp_params(params, compute_dtype=jnp.float32):
    """One-time prep: w kept in native (out, in) cast to compute dtype; b (out,1) f32."""
    return [(jnp.asarray(w, compute_dtype),
             jnp.asarray(b, jnp.float32).reshape(-1, 1))
            for w, b in params]


def mlp_forward(x, prepared):
    """Exact MLP.forward semantics: ReLU after every layer except the last."""
    lead = x.shape[:-1]
    in_dim = x.shape[-1]
    out_dim = prepared[-1][0].shape[0]
    # TODO(synk): in production, have the producer/consumer work in the
    # transposed (features, rows) layout so these wrapper transposes vanish.
    xT = x.reshape(-1, in_dim).T                        # (in_dim, M)
    yT = fused_mlp_t(xT, prepared)                      # (out_dim, M)
    return yT.T.reshape(*lead, out_dim)


if __name__ == "__main__":
    key = jax.random.PRNGKey(0)
    batch, seq = 2, 8
    input_dim, hidden_dim, output_dim, num_layers = 16, 32, 4, 3

    kx, kp = jax.random.split(key)
    x = jax.random.normal(kx, (batch, seq, input_dim), jnp.float32)
    params = init_mlp_params(kp, input_dim, hidden_dim, output_dim, num_layers)

    # Pure-JAX f32 reference (nn.Linear: y = x @ w.T + b, ReLU except last).
    ref = x.reshape(-1, input_dim)
    for i, (w, b) in enumerate(params):
        ref = ref @ w.T + b
        if i < num_layers - 1:
            ref = jnp.maximum(ref, 0.0)
    ref = ref.reshape(batch, seq, output_dim)

    # (a) f32 weights path: tight tolerance.
    out_f32 = jax.block_until_ready(
        mlp_forward(x, prepare_mlp_params(params, jnp.float32)))
    assert out_f32.shape == (batch, seq, output_dim)
    assert jnp.allclose(out_f32, ref, atol=1e-5, rtol=1e-5)

    # (b) bf16 weights / f32 accumulation path (MXU peak): loosened tolerance.
    #     Note: activations are re-cast to bf16 per layer, so error compounds
    #     with depth; fine at num_layers=3.
    out_bf16 = jax.block_until_ready(
        mlp_forward(x, prepare_mlp_params(params, jnp.bfloat16)))
    assert out_bf16.shape == (batch, seq, output_dim)
    assert jnp.allclose(out_bf16, ref, atol=1e-1, rtol=5e-2)

    print("KERNEL_OK")
</pallas_src>

<mosaic_0001>
module attributes {stable_mosaic.version = 11 : i64} {
  func.func @_fused_mlp_kernel(%arg0: i32, %arg1: memref<16x16xf32, #tpu.memory_space<vmem>>, %arg2: memref<32x16xf32, #tpu.memory_space<vmem>>, %arg3: memref<32x1xf32, #tpu.memory_space<vmem>>, %arg4: memref<32x32xf32, #tpu.memory_space<vmem>>, %arg5: memref<32x1xf32, #tpu.memory_space<vmem>>, %arg6: memref<4x32xf32, #tpu.memory_space<vmem>>, %arg7: memref<4x1xf32, #tpu.memory_space<vmem>>, %arg8: memref<4x16xf32, #tpu.memory_space<vmem>>) attributes {dimension_semantics = [#tpu.dimension_semantics<parallel>], iteration_bounds = array<i64: 1>, scalar_prefetch = 0 : i64, scratch_operands = 0 : i64, tpu.core_type = #tpu.core_type<tc>, window_params = [{transform_indices = @transform_0, window_bounds = array<i64: 16, 16>}, {pipeline_mode = #tpu.pipeline_mode<synchronous>, transform_indices = @transform_1, window_bounds = array<i64: 32, 16>}, {pipeline_mode = #tpu.pipeline_mode<synchronous>, transform_indices = @transform_2, window_bounds = array<i64: 32, 1>}, {pipeline_mode = #tpu.pipeline_mode<synchronous>, transform_indices = @transform_3, window_bounds = array<i64: 32, 32>}, {pipeline_mode = #tpu.pipeline_mode<synchronous>, transform_indices = @transform_4, window_bounds = array<i64: 32, 1>}, {pipeline_mode = #tpu.pipeline_mode<synchronous>, transform_indices = @transform_5, window_bounds = array<i64: 4, 32>}, {pipeline_mode = #tpu.pipeline_mode<synchronous>, transform_indices = @transform_6, window_bounds = array<i64: 4, 1>}, {transform_indices = @transform_7, window_bounds = array<i64: 4, 16>}]} {
    %c0 = arith.constant 0 : index
    %c0_0 = arith.constant 0 : index
    %0 = vector.load %arg1[%c0, %c0_0] : memref<16x16xf32, #tpu.memory_space<vmem>>, vector<16x16xf32>
    %c0_1 = arith.constant 0 : index
    %c0_2 = arith.constant 0 : index
    %1 = vector.load %arg2[%c0_1, %c0_2] : memref<32x16xf32, #tpu.memory_space<vmem>>, vector<32x16xf32>
    %cst = arith.constant dense<0.000000e+00> : vector<32x16xf32>
    %2 = tpu.matmul %1, %0, %cst {dimension_numbers = #tpu.dot_dimension_numbers<[1], [0], [0], [1], [0, 0, 1, 1], [], []>} : vector<32x16xf32>, vector<16x16xf32>, vector<32x16xf32> -> vector<32x16xf32>
    %c0_3 = arith.constant 0 : index
    %c0_4 = arith.constant 0 : index
    %3 = vector.load %arg3[%c0_3, %c0_4] : memref<32x1xf32, #tpu.memory_space<vmem>>, vector<32x1xf32>
    %4 = vector.broadcast %3 : vector<32x1xf32> to vector<32x16xf32>
    %5 = arith.addf %2, %4 : vector<32x16xf32>
    %cst_5 = arith.constant 0.000000e+00 : f32
    %6 = vector.broadcast %cst_5 : f32 to vector<32x16xf32>
    %7 = arith.maximumf %5, %6 : vector<32x16xf32>
    %c0_6 = arith.constant 0 : index
    %c0_7 = arith.constant 0 : index
    %8 = vector.load %arg4[%c0_6, %c0_7] : memref<32x32xf32, #tpu.memory_space<vmem>>, vector<32x32xf32>
    %cst_8 = arith.constant dense<0.000000e+00> : vector<32x16xf32>
    %9 = tpu.matmul %8, %7, %cst_8 {dimension_numbers = #tpu.dot_dimension_numbers<[1], [0], [0], [1], [0, 0, 1, 1], [], []>} : vector<32x32xf32>, vector<32x16xf32>, vector<32x16xf32> -> vector<32x16xf32>
    %c0_9 = arith.constant 0 : index
    %c0_10 = arith.constant 0 : index
    %10 = vector.load %arg5[%c0_9, %c0_10] : memref<32x1xf32, #tpu.memory_space<vmem>>, vector<32x1xf32>
    %11 = vector.broadcast %10 : vector<32x1xf32> to vector<32x16xf32>
    %12 = arith.addf %9, %11 : vector<32x16xf32>
    %cst_11 = arith.constant 0.000000e+00 : f32
    %13 = vector.broadcast %cst_11 : f32 to vector<32x16xf32>
    %14 = arith.maximumf %12, %13 : vector<32x16xf32>
    %c0_12 = arith.constant 0 : index
    %c0_13 = arith.constant 0 : index
    %15 = vector.load %arg6[%c0_12, %c0_13] : memref<4x32xf32, #tpu.memory_space<vmem>>, vector<4x32xf32>
    %cst_14 = arith.constant dense<0.000000e+00> : vector<4x16xf32>
    %16 = tpu.matmul %15, %14, %cst_14 {dimension_numbers = #tpu.dot_dimension_numbers<[1], [0], [0], [1], [0, 0, 1, 1], [], []>} : vector<4x32xf32>, vector<32x16xf32>, vector<4x16xf32> -> vector<4x16xf32>
    %c0_15 = arith.constant 0 : index
    %c0_16 = arith.constant 0 : index
    %17 = vector.load %arg7[%c0_15, %c0_16] : memref<4x1xf32, #tpu.memory_space<vmem>>, vector<4x1xf32>
    %18 = vector.broadcast %17 : vector<4x1xf32> to vector<4x16xf32>
    %19 = arith.addf %16, %18 : vector<4x16xf32>
    %c0_17 = arith.constant 0 : index
    %c0_18 = arith.constant 0 : index
    %20 = vector.load %arg8[%c0_17, %c0_18] : memref<4x16xf32, #tpu.memory_space<vmem>>, vector<4x16xf32>
    tpu.vector_store %arg8[%c0_17, %c0_18], %19 {strides = array<i32>} : memref<4x16xf32, #tpu.memory_space<vmem>>, vector<4x16xf32>,
    return
  }
  func.func @transform_0(%arg0: i32) -> (i32, i32) {
    %c0_i32 = arith.constant 0 : i32
    %c0_i32_0 = arith.constant 0 : i32
    return %c0_i32, %arg0 : i32, i32
  }
  func.func @transform_1(%arg0: i32) -> (i32, i32) {
    %c0_i32 = arith.constant 0 : i32
    %c0_i32_0 = arith.constant 0 : i32
    %c0_i32_1 = arith.constant 0 : i32
    return %c0_i32, %c0_i32_0 : i32, i32
  }
  func.func @transform_2(%arg0: i32) -> (i32, i32) {
    %c0_i32 = arith.constant 0 : i32
    %c0_i32_0 = arith.constant 0 : i32
    %c0_i32_1 = arith.constant 0 : i32
    return %c0_i32, %c0_i32_0 : i32, i32
  }
  func.func @transform_3(%arg0: i32) -> (i32, i32) {
    %c0_i32 = arith.constant 0 : i32
    %c0_i32_0 = arith.constant 0 : i32
    %c0_i32_1 = arith.constant 0 : i32
    return %c0_i32, %c0_i32_0 : i32, i32
  }
  func.func @transform_4(%arg0: i32) -> (i32, i32) {
    %c0_i32 = arith.constant 0 : i32
    %c0_i32_0 = arith.constant 0 : i32
    %c0_i32_1 = arith.constant 0 : i32
    return %c0_i32, %c0_i32_0 : i32, i32
  }
  func.func @transform_5(%arg0: i32) -> (i32, i32) {
    %c0_i32 = arith.constant 0 : i32
    %c0_i32_0 = arith.constant 0 : i32
    %c0_i32_1 = arith.constant 0 : i32
    return %c0_i32, %c0_i32_0 : i32, i32
  }
  func.func @transform_6(%arg0: i32) -> (i32, i32) {
    %c0_i32 = arith.constant 0 : i32
    %c0_i32_0 = arith.constant 0 : i32
    %c0_i32_1 = arith.constant 0 : i32
    return %c0_i32, %c0_i32_0 : i32, i32
  }
  func.func @transform_7(%arg0: i32) -> (i32, i32) {
    %c0_i32 = arith.constant 0 : i32
    %c0_i32_0 = arith.constant 0 : i32
    return %c0_i32, %arg0 : i32, i32
  }
}

</mosaic_0001>

<bundles_post_ra>
// kernel: tpu_custom_call.1
= control target key start
LH: loop header
LB: loop body
LE: loop exit
PB: predicated region body
PF: predicated region fallthrough
CT: control target
= control target key end

     0   :  { %vm57_vm0 = vcmask 130048   ;;  %v476_v4 = vmov 0   ;;  %s592_s0 = inlined_call_operand.vmem [shape: f32[16,16], index: 0, kind: input, shape index: {}]   ;;  %s593_s1 = inlined_call_operand.vmem [shape: f32[32,16], index: 1, kind: input, shape index: {}]   ;;  %s594_s2 = inlined_call_operand.vmem [shape: f32[32,1], index: 2, kind: input, shape index: {}]   ;;  %s595_s3 = inlined_call_operand.vmem [shape: f32[32,32], index: 3, kind: input, shape index: {}]   ;;  %s596_s4 = inlined_call_operand.vmem [shape: f32[32,1], index: 4, kind: input, shape index: {}]   ;;  %s597_s5 = inlined_call_operand.vmem [shape: f32[4,32], index: 5, kind: input, shape index: {}]   ;;  %s598_s6 = inlined_call_operand.vmem [shape: f32[4,1], index: 6, kind: input, shape index: {}]   ;;  %s599_s7 = inlined_call_operand.hbm [shape: f32[4,16], index: 7, kind: output, shape index: {}]  }
   0x1   :  { %v28_v0 = vld [vmem:[%s592_s0 + $0x8] sm:$0xff]  ;;  %v27_v1 = vld [vmem:[%s592_s0] sm:$0xff]  ;;  %452 = vset.pattern.permute.xlu0 %v476_v4  ;;  %v36_v5 = vld [vmem:[%s594_s2 + $0x18] sm:$0xff]  ;;  %453 = vset.pattern.permute.xlu1 %v476_v4 }
   0x2   :  { %v29_v2 = vld [vmem:[%s593_s1] sm:$0xff]  ;;  %413 = vmatprep.subr.mxu0 %v28_v0  ;;  %v30_v3 = vld [vmem:[%s593_s1 + $0x8] sm:$0xff]  ;;  %v31_v6 = vld [vmem:[%s593_s1 + $0x10] sm:$0xff]  ;;  %54 = vperm.xlu0 %452, %v36_v5  }
   0x3   :  { %417 = vmatprep.mubr.msk.f32.mxu0 %vm57_vm0, %v29_v2  ;;  %414 = vmatpush3.msra.mxu0 %v28_v0  ;;  %v34_v7 = vld [vmem:[%s594_s2 + $0x8] sm:$0xff]  ;;  %v35_v8 = vld [vmem:[%s594_s2 + $0x10] sm:$0xff] }
   0x4   :  { %415 = vmatprep.subr.mxu0 %v27_v1  ;;  %44 = vperm.xlu1 %453, %v34_v7  }
   0x5   :  { %416 = vmatpush3.msra.mxu0 %v27_v1 }
   0x6   :  { %418 = vmatmul.mubr.msk.f32.vlgmr.msra.gmra.mxu0 %vm57_vm0, %v30_v3 }
   0x7   :  { %12 = vsyncpa [#allocation3], 0  ;;  %420 = vmatprep.mubr.msk.f32.mxu0 %vm57_vm0, %v31_v6  ;;  %v32_v9 = vld [vmem:[%s593_s1 + $0x18] sm:$0xff]  ;;  %v33_v10 = vld [vmem:[%s594_s2] sm:$0xff]  ;;  %49 = vperm.xlu0 %452, %v35_v8   ;;  %vm187_vm1 = vcmask 261120   ;;  %v477_v36 = vmov 0.0  }
   0x8   :  { %v166_v11 = vld [vmem:[%s596_s4 + $0x18] sm:$0xff]  ;;  %39 = vperm.xlu1 %453, %v33_v10   ;;  %v165_v12 = vld [vmem:[%s596_s4 + $0x10] sm:$0xff]  ;;  %v164_v13 = vld [vmem:[%s596_s4 + $0x8] sm:$0xff]  ;;  %437 = vmatprep.subr.mxu0 %v477_v36  ;;  %vm478_vm2 = vmmov 0   ;;  %s479_s11 = smov [#allocation2]   ;;  %vm369_vm3 = vcmask 125952  }
   0x9   :  { %v163_v14 = vld [vmem:[%s596_s4] sm:$0xff]  ;;  %v160_v33 = vld [vmem:[%s595_s3 + $0x8] sm:$0xff]  ;;  %v161_v34 = vld [vmem:[%s595_s3 + $0x10] sm:$0xff]  ;;  %s377_s12 = sshll.u32 %s479_s11, 4  ;;  %s378_s12 = int_to_ptr.vmem [resolvable:$true] %s377_s12 }
   0xa   :  { %421 = vmatmul.mubr.msk.f32.gmra.mxu0 %vm57_vm0, %v32_v9  ;;  %v290_v15 = vld [vmem:[%s598_s6] sm:$0xf]  ;;  %v162_v35 = vld [vmem:[%s595_s3 + $0x18] sm:$0xff]  ;;  %s454_s13 = scalar_lea.vmem %s378_s12, 64  ;;  %p459_p1 = scmp.lt.s32.totalorder %s378_s12, %s378_s12 }
   0xb   :  { %184 = vperm.xlu0 %452, %v166_v11   ;;  %v159_v16 = vld [vmem:[%s595_s3] sm:$0xff]  ;;  %445 = vmatprep.mubr.msk.f32.mxu0 %vm478_vm2, %v477_v36  ;;  %p455_p0 = scmp.ne.s32.totalorder %s378_s12, %s454_s13  ;;  %p460_p2 = scmp.lt.s32.totalorder %s454_s13, %s454_s13 }
   0xc   :  { %179 = vperm.xlu1 %453, %v165_v12   ;;  %431 = vmatprep.mubr.msk.f32.mxu1 %vm187_vm1, %v159_v16  ;;  %v289_v53 = vld [vmem:[%s597_s5] sm:$0xf] }
   0xd   :  { %p461_p3 = por %p460_p2, %p459_p1 }
   0xf   :  { %174 = vperm.xlu0 %452, %v164_v13   ;;  %p462_p4 = pnand %p461_p3, %p455_p0 }
  0x10   :  { %169 = vperm.xlu1 %453, %v163_v14  }
  0x13   :  { %293 = vperm.xlu0 %452, %v290_v15  }
  0x7d   :  { %v55_v17 = vpop.permute.xlu0 %54 }
  0x7f   :  { %v45_v19 = vpop.permute.xlu1 %44 }
  0x82   :  { %v50_v23 = vpop.permute.xlu0 %49 }
  0x83   :  { %v40_v28 = vpop.permute.xlu1 %39 }
  0x86   :  { %v185_v37 = vpop.permute.xlu0 %184 }
  0x87   :  { %v180_v39 = vpop.permute.xlu1 %179 }
  0x8a   :  { %v175_v43 = vpop.permute.xlu0 %174 }
  0x8b   :  { %v170_v48 = vpop.permute.xlu1 %169 }
  0x8e   :  { %v294_v54 = vpop.permute.xlu0 %293 }
  0xc6   :  { %v419_v18 = vpop.f32.mrf.mxu0 }
  0xc7   :  { %v142_v25 = vadd.f32 %v419_v18, %v45_v19 }
  0xc8   :  { %v136_v20 = vpop.f32.mrf.mxu0 }
  0xc9   :  { %v137_v29 = vadd.f32 %v136_v20, %v40_v28  ;;  %v156_v31 = vmax.f32 %v142_v25, 0.0 }
  0xca   :  { %v422_v21 = vpop.f32.mrf.mxu0 }
  0xcb   :  { %v152_v22 = vadd.f32 %v422_v21, %v55_v17  ;;  %v155_v32 = vmax.f32 %v137_v29, 0.0 }
  0xcc   :  { %v146_v24 = vpop.f32.mrf.mxu0 }
  0xcd   :  { %v158_v26 = vmax.f32 %v152_v22, 0.0  ;;  %v147_v27 = vadd.f32 %v146_v24, %v50_v23 }
  0xcf   :  { %v157_v30 = vmax.f32 %v147_v27, 0.0  ;;  %423 = vmatprep.subr.mxu1 %v158_v26 }
  0xd0   :  { %424 = vmatpush3.msra.mxu1 %v158_v26 }
  0xd1   :  { %425 = vmatprep.subr.mxu1 %v157_v30 }
  0xd2   :  { %426 = vmatpush3.msra.mxu1 %v157_v30 }
  0xd3   :  { %427 = vmatprep.subr.mxu1 %v156_v31 }
  0xd4   :  { %428 = vmatpush3.msra.mxu1 %v156_v31 }
  0xd5   :  { %429 = vmatprep.subr.mxu1 %v155_v32 }
  0xd6   :  { %430 = vmatpush3.msra.mxu1 %v155_v32 }
  0xd7   :  { %432 = vmatmul.mubr.msk.f32.vlgmr.msra.gmra.mxu1 %vm187_vm1, %v160_v33 }
  0xd8   :  { %434 = vmatprep.mubr.msk.f32.mxu1 %vm187_vm1, %v161_v34 }
  0xdb   :  { %435 = vmatmul.mubr.msk.f32.gmra.mxu1 %vm187_vm1, %v162_v35 }
 0x197   :  { %v433_v38 = vpop.f32.mrf.mxu1 }
 0x198   :  { %v272_v45 = vadd.f32 %v433_v38, %v175_v43 }
 0x199   :  { %v266_v40 = vpop.f32.mrf.mxu1 }
 0x19a   :  { %v267_v49 = vadd.f32 %v266_v40, %v170_v48  ;;  %v286_v51 = vmax.f32 %v272_v45, 0.0 }
 0x19b   :  { %v436_v41 = vpop.f32.mrf.mxu1 }
 0x19c   :  { %v282_v42 = vadd.f32 %v436_v41, %v185_v37  ;;  %v285_v52 = vmax.f32 %v267_v49, 0.0 }
 0x19d   :  { %v276_v44 = vpop.f32.mrf.mxu1 }
 0x19e   :  { %v288_v46 = vmax.f32 %v282_v42, 0.0  ;;  %v277_v47 = vadd.f32 %v276_v44, %v180_v39 }
 0x1a0   :  { %v287_v50 = vmax.f32 %v277_v47, 0.0  ;;  %438 = vmatpush3.msra.mxu0 %v288_v46 }
 0x1a1   :  { %439 = vmatprep.subr.mxu0 %v477_v36 }
 0x1a2   :  { %440 = vmatpush3.msra.mxu0 %v287_v50 }
 0x1a3   :  { %441 = vmatprep.subr.mxu0 %v477_v36 }
 0x1a4   :  { %442 = vmatpush3.msra.mxu0 %v286_v51 }
 0x1a5   :  { %443 = vmatprep.subr.mxu0 %v477_v36 }
 0x1a6   :  { %444 = vmatpush3.msra.mxu0 %v285_v52 }
 0x1a7   :  { %446 = vmatmul.mubr.msk.f32.vlgmr.msra.gmra.mxu0 %vm187_vm1, %v289_v53 }
 0x267   :  { %v365_v55 = vpop.f32.mrf.mxu0 }
 0x268   :  { %v366_v56 = vadd.f32 %v365_v55, %v294_v54 }
 0x269   :  { %v447_v57 = vpop.f32.mrf.mxu0 }
 0x26a   :  { %370 = vst.msk [vmem:[#allocation2] sm:$0xf] %vm369_vm3, %v366_v56 }
 0x26b   :  { %465 = shalt.err (!%p462_p4)
}
 0x26c   :  { %380 = dma.vmem_to_hbm [thread:$0]  %s378_s12, 64, %s599_s7, [#allocation3]  }
 0x26d   :  { %474 = dma.done.wait [#allocation3], 64  }
 0x26e   :  { %475 = vsyncadd [#allocation3], 4294967232 }
 0x26f   :  { %384 = vsyncpa [#allocation3], 1 }

</bundles_post_ra>
